<compile_context>
chip_gen: v5e
topology: v5e:2x2
jax: 0.10.0
libtpu: 0.0.40
codegen_flags: <defaults>
</compile_context>

<pallas_src>
import functools

import jax
import jax.numpy as jnp
from jax.experimental import pallas as pl
from jax.experimental.pallas import tpu as pltpu


def _round_up(n, m):
    return ((n + m - 1) // m) * m


def _pad2(a, shape):
    return jnp.pad(a, ((0, shape[0] - a.shape[0]), (0, shape[1] - a.shape[1])))


def _two_layer_pca_kernel(x_ref,
                          w1_ref, b1_ref,
                          w23_ref, b23_ref,
                          w4_ref, b4_ref,
                          out_ref):
    # x: (TB, F) bf16; weights bf16 (VMEM-resident); biases f32; output f32.
    x = x_ref[...]

    # encoder layer 1 + ReLU   (bf16 MXU, f32 accumulate, f32 epilogue)
    h1 = jnp.dot(x, w1_ref[...], preferred_element_type=jnp.float32) + b1_ref[...]
    h1 = jnp.maximum(h1, 0.0)

    # fused (encoder layer 2 ∘ decoder layer 1) + ReLU
    h2 = jnp.dot(h1.astype(w23_ref.dtype), w23_ref[...],
                 preferred_element_type=jnp.float32) + b23_ref[...]
    h2 = jnp.maximum(h2, 0.0)

    # decoder layer 2
    out = jnp.dot(h2.astype(w4_ref.dtype), w4_ref[...],
                  preferred_element_type=jnp.float32) + b4_ref[...]
    out_ref[...] = out.astype(out_ref.dtype)


@functools.partial(jax.jit, static_argnames=("tb", "compute_dtype"))
def two_layer_pca_forward(x, params, *, tb=256, compute_dtype=jnp.bfloat16):
    """x: (B, F) float32. params: weights pre-transposed to (in, out), biases (1, out)."""
    B, F = x.shape
    w1, b1 = params["w1"], params["b1"]   # (F, H), (1, H)
    w2, b2 = params["w2"], params["b2"]   # (H, O), (1, O)
    w3, b3 = params["w3"], params["b3"]   # (O, H), (1, H)
    w4, b4 = params["w4"], params["b4"]   # (H, F), (1, F)
    H = w1.shape[1]

    # Fold encoder-out (H->O) and decoder-in (O->H): no nonlinearity between them.
    w23 = w2 @ w3                          # (H, H)
    b23 = b2 @ w3 + b3                     # (1, H)

    # Zero-pad lane (output) dims to multiples of 128 -> unmasked vregs / stores.
    HP = _round_up(H, 128)
    FP = _round_up(F, 128)

    w1p = _pad2(w1, (F, HP)).astype(compute_dtype)
    b1p = _pad2(b1, (1, HP)).astype(jnp.float32)
    w23p = _pad2(w23, (HP, HP)).astype(compute_dtype)
    b23p = _pad2(b23, (1, HP)).astype(jnp.float32)
    w4p = _pad2(w4, (HP, FP)).astype(compute_dtype)
    b4p = _pad2(b4, (1, FP)).astype(jnp.float32)

    # Batch tiling (TB rows / grid step). TB multiple of 8; 256 fills a v6e/v7x MXU pass.
    TB = min(tb, _round_up(B, 8))
    Bp = _round_up(B, TB)
    xp = jnp.pad(x, ((0, Bp - B), (0, 0))).astype(compute_dtype)

    const2d = lambda a: pl.BlockSpec(a.shape, lambda i: (0, 0))

    out = pl.pallas_call(
        _two_layer_pca_kernel,
        out_shape=jax.ShapeDtypeStruct((Bp, FP), jnp.float32),
        grid=(Bp // TB,),
        in_specs=[
            pl.BlockSpec((TB, F), lambda i: (i, 0)),   # x: tiled along batch
            const2d(w1p), const2d(b1p),                # weights/biases: VMEM-resident
            const2d(w23p), const2d(b23p),
            const2d(w4p), const2d(b4p),
        ],
        out_specs=pl.BlockSpec((TB, FP), lambda i: (i, 0)),
        compiler_params=pltpu.CompilerParams(
            dimension_semantics=("parallel",)),
    )(xp, w1p, b1p, w23p, b23p, w4p, b4p)

    return out[:B, :F]


def init_params(key, feature_size, hidden_size, output_size):
    """Deterministic init mimicking nn.Linear's uniform(-1/sqrt(in), 1/sqrt(in)).
    Weights are stored pre-transposed as (in, out)."""
    ks = jax.random.split(key, 8)

    def linear(kw, kb, fan_in, fan_out):
        bound = 1.0 / jnp.sqrt(jnp.float32(fan_in))
        w = jax.random.uniform(kw, (fan_in, fan_out), jnp.float32, -bound, bound)
        b = jax.random.uniform(kb, (1, fan_out), jnp.float32, -bound, bound)
        return w, b

    w1, b1 = linear(ks[0], ks[1], feature_size, hidden_size)
    w2, b2 = linear(ks[2], ks[3], hidden_size, output_size)
    w3, b3 = linear(ks[4], ks[5], output_size, hidden_size)
    w4, b4 = linear(ks[6], ks[7], hidden_size, feature_size)
    return dict(w1=w1, b1=b1, w2=w2, b2=b2, w3=w3, b3=b3, w4=w4, b4=b4)


if __name__ == "__main__":
    feature_size, hidden_size, output_size = 32, 32, 8
    batch = 8

    key = jax.random.PRNGKey(0)
    k_x, k_p = jax.random.split(key)
    x = jax.random.normal(k_x, (batch, feature_size), jnp.float32)
    params = init_params(k_p, feature_size, hidden_size, output_size)

    out = two_layer_pca_forward(x, params)
    out = jax.block_until_ready(out)
    assert out.shape == (batch, feature_size)

    # (1) semantic reference: plain f32, unfused — exactly the PyTorch forward.
    def ref_f32(x, p):
        h1 = jnp.maximum(x @ p["w1"] + p["b1"], 0.0)
        z = h1 @ p["w2"] + p["b2"]
        h2 = jnp.maximum(z @ p["w3"] + p["b3"], 0.0)
        return h2 @ p["w4"] + p["b4"]

    # (2) numerics reference mirroring the kernel (bf16 inputs/weights, fused W23,
    #     f32 accumulation) — tight check of the kernel itself.
    def ref_bf16(x, p):
        up = lambda a: a.astype(jnp.bfloat16).astype(jnp.float32)
        w23 = p["w2"] @ p["w3"]
        b23 = p["b2"] @ p["w3"] + p["b3"]
        h1 = jnp.maximum(up(x) @ up(p["w1"]) + p["b1"], 0.0)
        h2 = jnp.maximum(up(h1) @ up(w23) + b23, 0.0)
        return up(h2) @ up(p["w4"]) + p["b4"]

    exp_bf16 = ref_bf16(x, params)
    exp_f32 = ref_f32(x, params)
    assert jnp.allclose(out, exp_bf16, atol=1e-3, rtol=1e-2), \
        float(jnp.max(jnp.abs(out - exp_bf16)))
    assert jnp.allclose(out, exp_f32, atol=5e-2, rtol=5e-2), \
        float(jnp.max(jnp.abs(out - exp_f32)))
    print("KERNEL_OK")
</pallas_src>

<mosaic_0001>
module attributes {stable_mosaic.version = 11 : i64} {
  func.func @_two_layer_pca_kernel(%arg0: i32, %arg1: memref<8x32xbf16, #tpu.memory_space<vmem>>, %arg2: memref<32x128xbf16, #tpu.memory_space<vmem>>, %arg3: memref<1x128xf32, #tpu.memory_space<vmem>>, %arg4: memref<128x128xbf16, #tpu.memory_space<vmem>>, %arg5: memref<1x128xf32, #tpu.memory_space<vmem>>, %arg6: memref<128x128xbf16, #tpu.memory_space<vmem>>, %arg7: memref<1x128xf32, #tpu.memory_space<vmem>>, %arg8: memref<8x128xf32, #tpu.memory_space<vmem>>) attributes {dimension_semantics = [#tpu.dimension_semantics<parallel>], iteration_bounds = array<i64: 1>, scalar_prefetch = 0 : i64, scratch_operands = 0 : i64, tpu.core_type = #tpu.core_type<tc>, window_params = [{transform_indices = @transform_0, window_bounds = array<i64: 8, 32>}, {pipeline_mode = #tpu.pipeline_mode<synchronous>, transform_indices = @transform_1, window_bounds = array<i64: 32, 128>}, {pipeline_mode = #tpu.pipeline_mode<synchronous>, transform_indices = @transform_2, window_bounds = array<i64: 1, 128>}, {pipeline_mode = #tpu.pipeline_mode<synchronous>, transform_indices = @transform_3, window_bounds = array<i64: 128, 128>}, {pipeline_mode = #tpu.pipeline_mode<synchronous>, transform_indices = @transform_4, window_bounds = array<i64: 1, 128>}, {pipeline_mode = #tpu.pipeline_mode<synchronous>, transform_indices = @transform_5, window_bounds = array<i64: 128, 128>}, {pipeline_mode = #tpu.pipeline_mode<synchronous>, transform_indices = @transform_6, window_bounds = array<i64: 1, 128>}, {transform_indices = @transform_7, window_bounds = array<i64: 8, 128>}]} {
    %c0 = arith.constant 0 : index
    %c0_0 = arith.constant 0 : index
    %0 = vector.load %arg1[%c0, %c0_0] : memref<8x32xbf16, #tpu.memory_space<vmem>>, vector<8x32xbf16>
    %c0_1 = arith.constant 0 : index
    %c0_2 = arith.constant 0 : index
    %1 = vector.load %arg2[%c0_1, %c0_2] : memref<32x128xbf16, #tpu.memory_space<vmem>>, vector<32x128xbf16>
    %cst = arith.constant dense<0.000000e+00> : vector<8x128xf32>
    %2 = tpu.matmul %0, %1, %cst {dimension_numbers = #tpu.dot_dimension_numbers<[1], [0], [0], [1], [0, 0, 1, 1], [], []>} : vector<8x32xbf16>, vector<32x128xbf16>, vector<8x128xf32> -> vector<8x128xf32>
    %c0_3 = arith.constant 0 : index
    %c0_4 = arith.constant 0 : index
    %3 = vector.load %arg3[%c0_3, %c0_4] : memref<1x128xf32, #tpu.memory_space<vmem>>, vector<1x128xf32>
    %4 = vector.broadcast %3 : vector<1x128xf32> to vector<8x128xf32>
    %5 = arith.addf %2, %4 : vector<8x128xf32>
    %cst_5 = arith.constant 0.000000e+00 : f32
    %6 = vector.broadcast %cst_5 : f32 to vector<8x128xf32>
    %7 = arith.maximumf %5, %6 : vector<8x128xf32>
    %8 = arith.truncf %7 : vector<8x128xf32> to vector<8x128xbf16>
    %c0_6 = arith.constant 0 : index
    %c0_7 = arith.constant 0 : index
    %9 = vector.load %arg4[%c0_6, %c0_7] : memref<128x128xbf16, #tpu.memory_space<vmem>>, vector<128x128xbf16>
    %cst_8 = arith.constant dense<0.000000e+00> : vector<8x128xf32>
    %10 = tpu.matmul %8, %9, %cst_8 {dimension_numbers = #tpu.dot_dimension_numbers<[1], [0], [0], [1], [0, 0, 1, 1], [], []>} : vector<8x128xbf16>, vector<128x128xbf16>, vector<8x128xf32> -> vector<8x128xf32>
    %c0_9 = arith.constant 0 : index
    %c0_10 = arith.constant 0 : index
    %11 = vector.load %arg5[%c0_9, %c0_10] : memref<1x128xf32, #tpu.memory_space<vmem>>, vector<1x128xf32>
    %12 = vector.broadcast %11 : vector<1x128xf32> to vector<8x128xf32>
    %13 = arith.addf %10, %12 : vector<8x128xf32>
    %cst_11 = arith.constant 0.000000e+00 : f32
    %14 = vector.broadcast %cst_11 : f32 to vector<8x128xf32>
    %15 = arith.maximumf %13, %14 : vector<8x128xf32>
    %16 = arith.truncf %15 : vector<8x128xf32> to vector<8x128xbf16>
    %c0_12 = arith.constant 0 : index
    %c0_13 = arith.constant 0 : index
    %17 = vector.load %arg6[%c0_12, %c0_13] : memref<128x128xbf16, #tpu.memory_space<vmem>>, vector<128x128xbf16>
    %cst_14 = arith.constant dense<0.000000e+00> : vector<8x128xf32>
    %18 = tpu.matmul %16, %17, %cst_14 {dimension_numbers = #tpu.dot_dimension_numbers<[1], [0], [0], [1], [0, 0, 1, 1], [], []>} : vector<8x128xbf16>, vector<128x128xbf16>, vector<8x128xf32> -> vector<8x128xf32>
    %c0_15 = arith.constant 0 : index
    %c0_16 = arith.constant 0 : index
    %19 = vector.load %arg7[%c0_15, %c0_16] : memref<1x128xf32, #tpu.memory_space<vmem>>, vector<1x128xf32>
    %20 = vector.broadcast %19 : vector<1x128xf32> to vector<8x128xf32>
    %21 = arith.addf %18, %20 : vector<8x128xf32>
    %c0_17 = arith.constant 0 : index
    %c0_18 = arith.constant 0 : index
    %22 = vector.load %arg8[%c0_17, %c0_18] : memref<8x128xf32, #tpu.memory_space<vmem>>, vector<8x128xf32>
    tpu.vector_store %arg8[%c0_17, %c0_18], %21 {strides = array<i32>} : memref<8x128xf32, #tpu.memory_space<vmem>>, vector<8x128xf32>,
    return
  }
  func.func @transform_0(%arg0: i32) -> (i32, i32) {
    %c0_i32 = arith.constant 0 : i32
    %c0_i32_0 = arith.constant 0 : i32
    return %arg0, %c0_i32 : i32, i32
  }
  func.func @transform_1(%arg0: i32) -> (i32, i32) {
    %c0_i32 = arith.constant 0 : i32
    %c0_i32_0 = arith.constant 0 : i32
    %c0_i32_1 = arith.constant 0 : i32
    return %c0_i32, %c0_i32_0 : i32, i32
  }
  func.func @transform_2(%arg0: i32) -> (i32, i32) {
    %c0_i32 = arith.constant 0 : i32
    %c0_i32_0 = arith.constant 0 : i32
    %c0_i32_1 = arith.constant 0 : i32
    return %c0_i32, %c0_i32_0 : i32, i32
  }
  func.func @transform_3(%arg0: i32) -> (i32, i32) {
    %c0_i32 = arith.constant 0 : i32
    %c0_i32_0 = arith.constant 0 : i32
    %c0_i32_1 = arith.constant 0 : i32
    return %c0_i32, %c0_i32_0 : i32, i32
  }
  func.func @transform_4(%arg0: i32) -> (i32, i32) {
    %c0_i32 = arith.constant 0 : i32
    %c0_i32_0 = arith.constant 0 : i32
    %c0_i32_1 = arith.constant 0 : i32
    return %c0_i32, %c0_i32_0 : i32, i32
  }
  func.func @transform_5(%arg0: i32) -> (i32, i32) {
    %c0_i32 = arith.constant 0 : i32
    %c0_i32_0 = arith.constant 0 : i32
    %c0_i32_1 = arith.constant 0 : i32
    return %c0_i32, %c0_i32_0 : i32, i32
  }
  func.func @transform_6(%arg0: i32) -> (i32, i32) {
    %c0_i32 = arith.constant 0 : i32
    %c0_i32_0 = arith.constant 0 : i32
    %c0_i32_1 = arith.constant 0 : i32
    return %c0_i32, %c0_i32_0 : i32, i32
  }
  func.func @transform_7(%arg0: i32) -> (i32, i32) {
    %c0_i32 = arith.constant 0 : i32
    %c0_i32_0 = arith.constant 0 : i32
    return %arg0, %c0_i32 : i32, i32
  }
}

</mosaic_0001>

<bundles_post_ra>
// kernel: two_layer_pca_forward.1
= control target key start
LH: loop header
LB: loop body
LE: loop exit
PB: predicated region body
PF: predicated region fallthrough
CT: control target
= control target key end

     0   :  { %s480_s0 = inlined_call_operand.vmem [shape: bf16[8,32], index: 0, kind: input, shape index: {}]   ;;  %s481_s1 = inlined_call_operand.vmem [shape: bf16[32,128], index: 1, kind: input, shape index: {}]   ;;  %s482_s2 = inlined_call_operand.vmem [shape: f32[1,128], index: 2, kind: input, shape index: {}]   ;;  %s483_s3 = inlined_call_operand.vmem [shape: bf16[128,128], index: 3, kind: input, shape index: {}]   ;;  %s484_s4 = inlined_call_operand.vmem [shape: f32[1,128], index: 4, kind: input, shape index: {}]   ;;  %s485_s5 = inlined_call_operand.vmem [shape: bf16[128,128], index: 5, kind: input, shape index: {}]   ;;  %s486_s6 = inlined_call_operand.vmem [shape: f32[1,128], index: 6, kind: input, shape index: {}]   ;;  %s487_s7 = inlined_call_operand.hbm [shape: f32[8,128], index: 7, kind: output, shape index: {}]  }
   0x1   :  { %v323_v0 = vld [vmem:[%s481_s1 + $0x8] sm:$0xff]  ;;  %v331_v1 = vld [vmem:[%s483_s3 + $0x38] sm:$0xff]  ;;  %v322_v2 = vld [vmem:[%s481_s1] sm:$0xff] }
   0x2   :  { %59 = vmatpush.bf16.msra.mxu0 %v323_v0  ;;  %136 = vmatpush.bf16.msra.mxu1 %v331_v1  ;;  %v330_v3 = vld [vmem:[%s483_s3 + $0x30] sm:$0xff] }
   0x3   :  { %12 = vsyncpa [#allocation3], 0  ;;  %v28_v4 = vld [vmem:[%s480_s0] sm:$0xf]  ;;  %vm49_vm0 = vcmask 261120   ;;  %v329_v5 = vld [vmem:[%s483_s3 + $0x28] sm:$0xff] }
   0x4   :  { %v328_v6 = vld [vmem:[%s483_s3 + $0x20] sm:$0xff]  ;;  %v327_v7 = vld [vmem:[%s483_s3 + $0x18] sm:$0xff]  ;;  %v326_v8 = vld [vmem:[%s483_s3 + $0x10] sm:$0xff]  ;;  %s370_s0 = smov [#allocation2]  }
   0x5   :  { %v325_v9 = vld [vmem:[%s483_s3 + $0x8] sm:$0xff]  ;;  %v324_v10 = vld [vmem:[%s483_s3] sm:$0xff]  ;;  %v339_v11 = vld [vmem:[%s485_s5 + $0x38] sm:$0xff]  ;;  %s238_s17 = sshll.u32 %s370_s0, 4  ;;  %s239_s17 = int_to_ptr.vmem [resolvable:$true] %s238_s17 }
   0x6   :  { %60 = vmatpush.bf16.msra.mxu0 %v322_v2  ;;  %137 = vmatpush.bf16.msra.mxu1 %v330_v3  ;;  %v338_v12 = vld [vmem:[%s485_s5 + $0x30] sm:$0xff]  ;;  %v337_v13 = vld [vmem:[%s485_s5 + $0x28] sm:$0xff]  ;;  %v336_v14 = vld [vmem:[%s485_s5 + $0x20] sm:$0xff] }
   0x7   :  { %219 = vmatpush.bf16.msra.mxu2 %v339_v11  ;;  %v335_v15 = vld [vmem:[%s485_s5 + $0x18] sm:$0xff]  ;;  %v334_v16 = vld [vmem:[%s485_s5 + $0x10] sm:$0xff]  ;;  %v341_v17 = vld [vmem:[%s482_s2] ss:$0 sm:$0xff] }
   0x8   :  { %v333_v23 = vld [vmem:[%s485_s5 + $0x8] sm:$0xff]  ;;  %v332_v24 = vld [vmem:[%s485_s5] sm:$0xff]  ;;  %s240_s5 = sshll.u32 %s487_s7, 4  ;;  %s241_s5 = int_to_ptr.hbm [resolvable:$true] %s240_s5 }
   0x9   :  { %257 = vmatmul.msk.bf16.vlgmr.msra.gmra.mxu0 %vm49_vm0, %v28_v4  ;;  %v342_v25 = vld [vmem:[%s484_s4] ss:$0 sm:$0xff] }
   0xa   :  { %138 = vmatpush.bf16.msra.mxu1 %v329_v5  ;;  %v343_v31 = vld [vmem:[%s486_s6] ss:$0 sm:$0xff] }
   0xb   :  { %220 = vmatpush.bf16.msra.mxu2 %v338_v12 }
   0xe   :  { %139 = vmatpush.bf16.msra.mxu1 %v328_v6 }
   0xf   :  { %221 = vmatpush.bf16.msra.mxu2 %v337_v13 }
  0x12   :  { %140 = vmatpush.bf16.msra.mxu1 %v327_v7 }
  0x13   :  { %222 = vmatpush.bf16.msra.mxu2 %v336_v14 }
  0x16   :  { %141 = vmatpush.bf16.msra.mxu1 %v326_v8 }
  0x17   :  { %223 = vmatpush.bf16.msra.mxu2 %v335_v15 }
  0x1a   :  { %142 = vmatpush.bf16.msra.mxu1 %v325_v9 }
  0x1b   :  { %224 = vmatpush.bf16.msra.mxu2 %v334_v16 }
  0x1e   :  { %143 = vmatpush.bf16.msra.mxu1 %v324_v10 }
  0x1f   :  { %225 = vmatpush.bf16.msra.mxu2 %v333_v23 }
  0x23   :  { %226 = vmatpush.bf16.msra.mxu2 %v332_v24 }
  0x86   :  { %v62_v18 = vpop.f32.mrf.mxu0 }
  0x87   :  { %v63_v19 = vadd.f32 %v341_v17, %v62_v18 }
  0x89   :  { %v66_v20 = vmax.f32 %v63_v19, 0.0 }
  0x8b   :  { %v67_v21 = vpack.c.bf16 %v66_v20, %v66_v20 }
  0x8d   :  { %144 = vmatmul.bf16.vlgmr.msra.gmra.mxu1 %v67_v21 }
  0x8e   :  { %v64_v22 = vpop.f32.mrf.mxu0 }
 0x10a   :  { %v145_v26 = vpop.f32.mrf.mxu1 }
 0x10b   :  { %v146_v27 = vadd.f32 %v342_v25, %v145_v26 }
 0x10d   :  { %v149_v28 = vmax.f32 %v146_v27, 0.0 }
 0x10f   :  { %v150_v29 = vpack.c.bf16 %v149_v28, %v149_v28 }
 0x111   :  { %227 = vmatmul.bf16.vlgmr.msra.gmra.mxu2 %v150_v29 }
 0x112   :  { %v147_v30 = vpop.f32.mrf.mxu1 }
 0x194   :  { %v228_v32 = vpop.f32.mrf.mxu2 }
 0x195   :  { %v229_v33 = vadd.f32 %v343_v31, %v228_v32 }
 0x197   :  { %232 = vst [vmem:[#allocation2] sm:$0xff] %v229_v33 }
 0x198   :  { %243 = dma.vmem_to_hbm [thread:$0]  %s239_s17, 128, %s241_s5, [#allocation3]  }
 0x19c   :  { %v230_v34 = vpop.f32.mrf.mxu2 }
 0x19d   :  { %368 = dma.done.wait [#allocation3], 128  }
 0x19e   :  { %369 = vsyncadd [#allocation3], 4294967168 }
 0x19f   :  { %248 = vsyncpa [#allocation3], 1 }

</bundles_post_ra>
